<compile_context>
chip_gen: v5e
topology: v5e:2x2
jax: 0.10.0
libtpu: 0.0.40
codegen_flags: <defaults>
</compile_context>

<pallas_src>
import jax
import jax.numpy as jnp
from jax.experimental import pallas as pl
from jax.experimental.pallas import tpu as pltpu


def _round_up(x, m):
    return ((x + m - 1) // m) * m


def actor_forward_kernel(x_ref, w1_ref, w2_ref, w3_ref, slab_ref, o_ref):
    eps = 1e-5  # nn.LayerNorm default

    fc1 = w1_ref.shape[1]
    fc2 = w2_ref.shape[1]
    n_pad = w3_ref.shape[1]

    # One small load for all vector params (rows: b1,g1,beta1,b2,g2,beta2,b3,0).
    slab = slab_ref[...]                       # [8, P] f32
    b1, g1, be1 = slab[0:1, :fc1], slab[1:2, :fc1], slab[2:3, :fc1]
    b2, g2, be2 = slab[3:4, :fc2], slab[4:5, :fc2], slab[5:6, :fc2]
    b3 = slab[6:7, :n_pad]

    x = x_ref[...]                             # [TB, D_in]

    # ---- fc1 + LayerNorm + ReLU (LN over true fc1 width) --------------------
    h = jnp.dot(x, w1_ref[...], preferred_element_type=jnp.float32) + b1
    m = jnp.mean(h, axis=-1, keepdims=True)
    v = jnp.mean(h * h, axis=-1, keepdims=True) - m * m
    h = (h - m) * jax.lax.rsqrt(v + eps) * g1 + be1
    h = jnp.maximum(h, 0.0)

    # ---- fc2 + LayerNorm + ReLU (LN over true fc2 width) --------------------
    h = jnp.dot(h, w2_ref[...], preferred_element_type=jnp.float32) + b2
    m = jnp.mean(h, axis=-1, keepdims=True)
    v = jnp.mean(h * h, axis=-1, keepdims=True) - m * m
    h = (h - m) * jax.lax.rsqrt(v + eps) * g2 + be2
    h = jnp.maximum(h, 0.0)

    # ---- mu head + tanh (lane-dense, padded action columns are zero) --------
    z = jnp.dot(h, w3_ref[...], preferred_element_type=jnp.float32) + b3
    o_ref[...] = jnp.tanh(z)


@jax.jit
def actor_forward(state, params):
    (w1, b1, g1, beta1, w2, b2, g2, beta2, w3, b3) = params
    batch, input_dim = state.shape
    fc1 = w1.shape[1]
    fc2 = w2.shape[1]
    n_actions = w3.shape[1]

    # Lane-dense output width and small-param slab width.
    n_pad = _round_up(n_actions, 128)
    P = max(fc1, fc2, n_pad)

    def row(v):
        v = v.reshape(1, -1).astype(jnp.float32)
        return jnp.pad(v, ((0, 0), (0, P - v.shape[1])))

    slab = jnp.concatenate(
        [row(b1), row(g1), row(beta1),
         row(b2), row(g2), row(beta2),
         row(b3), jnp.zeros((1, P), jnp.float32)],
        axis=0,
    )                                          # [8, P] — single DMA
    w3p = jnp.pad(w3, ((0, 0), (0, n_pad - n_actions)))  # zero cols -> tanh(0)=0

    # Batch tiling: weights stay resident (constant index_map); batch axis is
    # "parallel" so v7x megacore splits it.  TB<=256 keeps VMEM use tiny.
    TB = min(256, _round_up(batch, 8))
    padded_batch = _round_up(batch, TB)
    xs = jnp.pad(state.astype(jnp.float32), ((0, padded_batch - batch), (0, 0)))

    out = pl.pallas_call(
        actor_forward_kernel,
        out_shape=jax.ShapeDtypeStruct((padded_batch, n_pad), jnp.float32),
        grid_spec=pltpu.PrefetchScalarGridSpec(
            num_scalar_prefetch=0,
            grid=(padded_batch // TB,),
            in_specs=[
                pl.BlockSpec((TB, input_dim), lambda i: (i, 0)),   # state tile
                pl.BlockSpec((input_dim, fc1), lambda i: (0, 0)),  # w1 resident
                pl.BlockSpec((fc1, fc2), lambda i: (0, 0)),        # w2 resident
                pl.BlockSpec((fc2, n_pad), lambda i: (0, 0)),      # w3 resident
                pl.BlockSpec((8, P), lambda i: (0, 0)),            # param slab
            ],
            out_specs=pl.BlockSpec((TB, n_pad), lambda i: (i, 0)),
        ),
        compiler_params=pltpu.CompilerParams(
            dimension_semantics=("parallel",),
        ),
    )(xs, w1, w2, w3p, slab)

    return out[:batch, :n_actions]


def init_params(key, input_dim, fc1_dims, fc2_dims, n_actions):
    """Deterministic init mirroring the PyTorch module's uniform init scheme."""
    ks = jax.random.split(key, 6)
    f1 = 1.0 / jnp.sqrt(jnp.float32(input_dim))
    f2 = 1.0 / jnp.sqrt(jnp.float32(fc1_dims))
    f3 = 0.003

    # Weights stored as [in, out] (already transposed vs. torch's [out, in]).
    w1 = jax.random.uniform(ks[0], (input_dim, fc1_dims), jnp.float32, -f1, f1)
    b1 = jax.random.uniform(ks[1], (1, fc1_dims), jnp.float32, -f1, f1)
    g1 = jnp.ones((1, fc1_dims), jnp.float32)      # LayerNorm gamma
    beta1 = jnp.zeros((1, fc1_dims), jnp.float32)  # LayerNorm beta

    w2 = jax.random.uniform(ks[2], (fc1_dims, fc2_dims), jnp.float32, -f2, f2)
    b2 = jax.random.uniform(ks[3], (1, fc2_dims), jnp.float32, -f2, f2)
    g2 = jnp.ones((1, fc2_dims), jnp.float32)
    beta2 = jnp.zeros((1, fc2_dims), jnp.float32)

    w3 = jax.random.uniform(ks[4], (fc2_dims, n_actions), jnp.float32, -f3, f3)
    b3 = jax.random.uniform(ks[5], (1, n_actions), jnp.float32, -f3, f3)

    return (w1, b1, g1, beta1, w2, b2, g2, beta2, w3, b3)


def reference_forward(state, params):
    """Plain-JAX reference for correctness checking (matches torch semantics)."""
    (w1, b1, g1, beta1, w2, b2, g2, beta2, w3, b3) = params
    eps = 1e-5

    def ln(h, g, b):
        mu = jnp.mean(h, axis=-1, keepdims=True)
        var = jnp.mean(jnp.square(h - mu), axis=-1, keepdims=True)
        return (h - mu) * jax.lax.rsqrt(var + eps) * g + b

    h = jnp.maximum(ln(state @ w1 + b1, g1, beta1), 0.0)
    h = jnp.maximum(ln(h @ w2 + b2, g2, beta2), 0.0)
    return jnp.tanh(h @ w3 + b3)


if __name__ == "__main__":
    # Small shapes consistent with the module: input_dims=(16,), fc1=64, fc2=32,
    # n_actions=4, batch=8.
    batch, input_dim, fc1_dims, fc2_dims, n_actions = 8, 16, 64, 32, 4

    key = jax.random.PRNGKey(0)
    k_state, k_params, k_big = jax.random.split(key, 3)

    state = jax.random.normal(k_state, (batch, input_dim), jnp.float32)
    params = init_params(k_params, input_dim, fc1_dims, fc2_dims, n_actions)

    out = actor_forward(state, params)
    out = jax.block_until_ready(out)
    ref = reference_forward(state, params)
    assert out.shape == (batch, n_actions)
    assert jnp.allclose(out, ref, atol=2e-5, rtol=1e-4), "mismatch vs reference (small batch)"

    # Also exercise the batch-tiled / padded path (grid > 1, non-multiple batch).
    big_batch = 300
    big_state = jax.random.normal(k_big, (big_batch, input_dim), jnp.float32)
    big_out = jax.block_until_ready(actor_forward(big_state, params))
    big_ref = reference_forward(big_state, params)
    assert big_out.shape == (big_batch, n_actions)
    assert jnp.allclose(big_out, big_ref, atol=2e-5, rtol=1e-4), "mismatch vs reference (big batch)"

    print("KERNEL_OK")
</pallas_src>

<mosaic_0001>
module attributes {stable_mosaic.version = 11 : i64} {
  func.func @actor_forward_kernel(%arg0: i32, %arg1: memref<8x16xf32, #tpu.memory_space<vmem>>, %arg2: memref<16x64xf32, #tpu.memory_space<vmem>>, %arg3: memref<64x32xf32, #tpu.memory_space<vmem>>, %arg4: memref<32x128xf32, #tpu.memory_space<vmem>>, %arg5: memref<8x128xf32, #tpu.memory_space<vmem>>, %arg6: memref<8x128xf32, #tpu.memory_space<vmem>>) attributes {dimension_semantics = [#tpu.dimension_semantics<parallel>], iteration_bounds = array<i64: 1>, scalar_prefetch = 0 : i64, scratch_operands = 0 : i64, tpu.core_type = #tpu.core_type<tc>, window_params = [{transform_indices = @transform_0, window_bounds = array<i64: 8, 16>}, {pipeline_mode = #tpu.pipeline_mode<synchronous>, transform_indices = @transform_1, window_bounds = array<i64: 16, 64>}, {pipeline_mode = #tpu.pipeline_mode<synchronous>, transform_indices = @transform_2, window_bounds = array<i64: 64, 32>}, {pipeline_mode = #tpu.pipeline_mode<synchronous>, transform_indices = @transform_3, window_bounds = array<i64: 32, 128>}, {pipeline_mode = #tpu.pipeline_mode<synchronous>, transform_indices = @transform_4, window_bounds = array<i64: 8, 128>}, {transform_indices = @transform_5, window_bounds = array<i64: 8, 128>}]} {
    %c0 = arith.constant 0 : index
    %c0_0 = arith.constant 0 : index
    %0 = vector.load %arg5[%c0, %c0_0] : memref<8x128xf32, #tpu.memory_space<vmem>>, vector<8x128xf32>
    %1 = vector.extract_strided_slice %0 {offsets = [0, 0], sizes = [1, 64], strides = [1, 1]} : vector<8x128xf32> to vector<1x64xf32>
    %2 = vector.extract_strided_slice %0 {offsets = [1, 0], sizes = [1, 64], strides = [1, 1]} : vector<8x128xf32> to vector<1x64xf32>
    %3 = vector.extract_strided_slice %0 {offsets = [2, 0], sizes = [1, 64], strides = [1, 1]} : vector<8x128xf32> to vector<1x64xf32>
    %4 = vector.extract_strided_slice %0 {offsets = [3, 0], sizes = [1, 32], strides = [1, 1]} : vector<8x128xf32> to vector<1x32xf32>
    %5 = vector.extract_strided_slice %0 {offsets = [4, 0], sizes = [1, 32], strides = [1, 1]} : vector<8x128xf32> to vector<1x32xf32>
    %6 = vector.extract_strided_slice %0 {offsets = [5, 0], sizes = [1, 32], strides = [1, 1]} : vector<8x128xf32> to vector<1x32xf32>
    %7 = vector.extract_strided_slice %0 {offsets = [6, 0], sizes = [1, 128], strides = [1, 1]} : vector<8x128xf32> to vector<1x128xf32>
    %c0_1 = arith.constant 0 : index
    %c0_2 = arith.constant 0 : index
    %8 = vector.load %arg1[%c0_1, %c0_2] : memref<8x16xf32, #tpu.memory_space<vmem>>, vector<8x16xf32>
    %c0_3 = arith.constant 0 : index
    %c0_4 = arith.constant 0 : index
    %9 = vector.load %arg2[%c0_3, %c0_4] : memref<16x64xf32, #tpu.memory_space<vmem>>, vector<16x64xf32>
    %cst = arith.constant dense<0.000000e+00> : vector<8x64xf32>
    %10 = tpu.matmul %8, %9, %cst {dimension_numbers = #tpu.dot_dimension_numbers<[1], [0], [0], [1], [0, 0, 1, 1], [], []>} : vector<8x16xf32>, vector<16x64xf32>, vector<8x64xf32> -> vector<8x64xf32>
    %11 = vector.broadcast %1 : vector<1x64xf32> to vector<8x64xf32>
    %12 = arith.addf %10, %11 : vector<8x64xf32>
    %cst_5 = arith.constant dense<0.000000e+00> : vector<8xf32>
    %13 = vector.multi_reduction <add>, %12, %cst_5 [1] : vector<8x64xf32> to vector<8xf32>
    %14 = vector.shape_cast %13 : vector<8xf32> to vector<8x1xf32>
    %cst_6 = arith.constant 6.400000e+01 : f32
    %15 = vector.broadcast %cst_6 : f32 to vector<8x1xf32>
    %16 = arith.divf %14, %15 : vector<8x1xf32>
    %17 = arith.mulf %12, %12 : vector<8x64xf32>
    %cst_7 = arith.constant dense<0.000000e+00> : vector<8xf32>
    %18 = vector.multi_reduction <add>, %17, %cst_7 [1] : vector<8x64xf32> to vector<8xf32>
    %19 = vector.shape_cast %18 : vector<8xf32> to vector<8x1xf32>
    %cst_8 = arith.constant 6.400000e+01 : f32
    %20 = vector.broadcast %cst_8 : f32 to vector<8x1xf32>
    %21 = arith.divf %19, %20 : vector<8x1xf32>
    %22 = arith.mulf %16, %16 : vector<8x1xf32>
    %23 = arith.subf %21, %22 : vector<8x1xf32>
    %24 = vector.broadcast %16 : vector<8x1xf32> to vector<8x64xf32>
    %25 = arith.subf %12, %24 : vector<8x64xf32>
    %cst_9 = arith.constant 9.99999974E-6 : f32
    %26 = vector.broadcast %cst_9 : f32 to vector<8x1xf32>
    %27 = arith.addf %23, %26 : vector<8x1xf32>
    %28 = math.rsqrt %27 : vector<8x1xf32>
    %29 = vector.broadcast %28 : vector<8x1xf32> to vector<8x64xf32>
    %30 = arith.mulf %25, %29 : vector<8x64xf32>
    %31 = vector.broadcast %2 : vector<1x64xf32> to vector<8x64xf32>
    %32 = arith.mulf %30, %31 : vector<8x64xf32>
    %33 = vector.broadcast %3 : vector<1x64xf32> to vector<8x64xf32>
    %34 = arith.addf %32, %33 : vector<8x64xf32>
    %cst_10 = arith.constant 0.000000e+00 : f32
    %35 = vector.broadcast %cst_10 : f32 to vector<8x64xf32>
    %36 = arith.maximumf %34, %35 : vector<8x64xf32>
    %c0_11 = arith.constant 0 : index
    %c0_12 = arith.constant 0 : index
    %37 = vector.load %arg3[%c0_11, %c0_12] : memref<64x32xf32, #tpu.memory_space<vmem>>, vector<64x32xf32>
    %cst_13 = arith.constant dense<0.000000e+00> : vector<8x32xf32>
    %38 = tpu.matmul %36, %37, %cst_13 {dimension_numbers = #tpu.dot_dimension_numbers<[1], [0], [0], [1], [0, 0, 1, 1], [], []>} : vector<8x64xf32>, vector<64x32xf32>, vector<8x32xf32> -> vector<8x32xf32>
    %39 = vector.broadcast %4 : vector<1x32xf32> to vector<8x32xf32>
    %40 = arith.addf %38, %39 : vector<8x32xf32>
    %cst_14 = arith.constant dense<0.000000e+00> : vector<8xf32>
    %41 = vector.multi_reduction <add>, %40, %cst_14 [1] : vector<8x32xf32> to vector<8xf32>
    %42 = vector.shape_cast %41 : vector<8xf32> to vector<8x1xf32>
    %cst_15 = arith.constant 3.200000e+01 : f32
    %43 = vector.broadcast %cst_15 : f32 to vector<8x1xf32>
    %44 = arith.divf %42, %43 : vector<8x1xf32>
    %45 = arith.mulf %40, %40 : vector<8x32xf32>
    %cst_16 = arith.constant dense<0.000000e+00> : vector<8xf32>
    %46 = vector.multi_reduction <add>, %45, %cst_16 [1] : vector<8x32xf32> to vector<8xf32>
    %47 = vector.shape_cast %46 : vector<8xf32> to vector<8x1xf32>
    %cst_17 = arith.constant 3.200000e+01 : f32
    %48 = vector.broadcast %cst_17 : f32 to vector<8x1xf32>
    %49 = arith.divf %47, %48 : vector<8x1xf32>
    %50 = arith.mulf %44, %44 : vector<8x1xf32>
    %51 = arith.subf %49, %50 : vector<8x1xf32>
    %52 = vector.broadcast %44 : vector<8x1xf32> to vector<8x32xf32>
    %53 = arith.subf %40, %52 : vector<8x32xf32>
    %cst_18 = arith.constant 9.99999974E-6 : f32
    %54 = vector.broadcast %cst_18 : f32 to vector<8x1xf32>
    %55 = arith.addf %51, %54 : vector<8x1xf32>
    %56 = math.rsqrt %55 : vector<8x1xf32>
    %57 = vector.broadcast %56 : vector<8x1xf32> to vector<8x32xf32>
    %58 = arith.mulf %53, %57 : vector<8x32xf32>
    %59 = vector.broadcast %5 : vector<1x32xf32> to vector<8x32xf32>
    %60 = arith.mulf %58, %59 : vector<8x32xf32>
    %61 = vector.broadcast %6 : vector<1x32xf32> to vector<8x32xf32>
    %62 = arith.addf %60, %61 : vector<8x32xf32>
    %cst_19 = arith.constant 0.000000e+00 : f32
    %63 = vector.broadcast %cst_19 : f32 to vector<8x32xf32>
    %64 = arith.maximumf %62, %63 : vector<8x32xf32>
    %c0_20 = arith.constant 0 : index
    %c0_21 = arith.constant 0 : index
    %65 = vector.load %arg4[%c0_20, %c0_21] : memref<32x128xf32, #tpu.memory_space<vmem>>, vector<32x128xf32>
    %cst_22 = arith.constant dense<0.000000e+00> : vector<8x128xf32>
    %66 = tpu.matmul %64, %65, %cst_22 {dimension_numbers = #tpu.dot_dimension_numbers<[1], [0], [0], [1], [0, 0, 1, 1], [], []>} : vector<8x32xf32>, vector<32x128xf32>, vector<8x128xf32> -> vector<8x128xf32>
    %67 = vector.broadcast %7 : vector<1x128xf32> to vector<8x128xf32>
    %68 = arith.addf %66, %67 : vector<8x128xf32>
    %69 = math.tanh %68 : vector<8x128xf32>
    %c0_23 = arith.constant 0 : index
    %c0_24 = arith.constant 0 : index
    %70 = vector.load %arg6[%c0_23, %c0_24] : memref<8x128xf32, #tpu.memory_space<vmem>>, vector<8x128xf32>
    tpu.vector_store %arg6[%c0_23, %c0_24], %69 {strides = array<i32>} : memref<8x128xf32, #tpu.memory_space<vmem>>, vector<8x128xf32>,
    return
  }
  func.func @transform_0(%arg0: i32) -> (i32, i32) {
    %c0_i32 = arith.constant 0 : i32
    %c0_i32_0 = arith.constant 0 : i32
    return %arg0, %c0_i32 : i32, i32
  }
  func.func @transform_1(%arg0: i32) -> (i32, i32) {
    %c0_i32 = arith.constant 0 : i32
    %c0_i32_0 = arith.constant 0 : i32
    %c0_i32_1 = arith.constant 0 : i32
    return %c0_i32, %c0_i32_0 : i32, i32
  }
  func.func @transform_2(%arg0: i32) -> (i32, i32) {
    %c0_i32 = arith.constant 0 : i32
    %c0_i32_0 = arith.constant 0 : i32
    %c0_i32_1 = arith.constant 0 : i32
    return %c0_i32, %c0_i32_0 : i32, i32
  }
  func.func @transform_3(%arg0: i32) -> (i32, i32) {
    %c0_i32 = arith.constant 0 : i32
    %c0_i32_0 = arith.constant 0 : i32
    %c0_i32_1 = arith.constant 0 : i32
    return %c0_i32, %c0_i32_0 : i32, i32
  }
  func.func @transform_4(%arg0: i32) -> (i32, i32) {
    %c0_i32 = arith.constant 0 : i32
    %c0_i32_0 = arith.constant 0 : i32
    %c0_i32_1 = arith.constant 0 : i32
    return %c0_i32, %c0_i32_0 : i32, i32
  }
  func.func @transform_5(%arg0: i32) -> (i32, i32) {
    %c0_i32 = arith.constant 0 : i32
    %c0_i32_0 = arith.constant 0 : i32
    return %arg0, %c0_i32 : i32, i32
  }
}

</mosaic_0001>

<bundles_post_ra>
// kernel: actor_forward.1
= control target key start
LH: loop header
LB: loop body
LE: loop exit
PB: predicated region body
PF: predicated region fallthrough
CT: control target
= control target key end

     0   :  { %vm25_vm0 = vcmask 130048   ;;  %vm49_vm1 = vcmask 523264   ;;  %v204_v10 = vmov 64.0   ;;  %vm118_vm6 = vcmask 261120   ;;  %s302_s1 = inlined_call_operand.vmem [shape: f32[16,64], index: 1, kind: input, shape index: {}]   ;;  %s303_s0 = inlined_call_operand.vmem [shape: f32[8,16], index: 0, kind: input, shape index: {}]   ;;  %s304_s4 = inlined_call_operand.vmem [shape: f32[8,128], index: 4, kind: input, shape index: {}]   ;;  %s305_s2 = inlined_call_operand.vmem [shape: f32[64,32], index: 2, kind: input, shape index: {}]   ;;  %s306_s3 = inlined_call_operand.vmem [shape: f32[32,128], index: 3, kind: input, shape index: {}]   ;;  %s307_s5 = inlined_call_operand.vmem [shape: f32[8,128], index: 5, kind: output, shape index: {}]  }
   0x1   :  { %v23_v0 = vld [vmem:[%s302_s1 + $0x8] sm:$0xff]  ;;  %v22_v1 = vld [vmem:[%s302_s1] sm:$0xff]  ;;  %194 = vrcp.f32 %v204_v10  ;;  %v93_v14 = vld [vmem:[%s305_s2 + $0x38] sm:$0xff]  ;;  %v205_v52 = vmov 32.0  }
   0x2   :  { %43 = vmatpush.msra.mxu0 %v23_v0  ;;  %v21_v2 = vld [vmem:[%s303_s0] sm:$0xff]  ;;  %106 = vmatpush.msra.mxu1 %v93_v14  ;;  %v92_v16 = vld [vmem:[%s305_s2 + $0x30] sm:$0xff]  ;;  %v91_v17 = vld [vmem:[%s305_s2 + $0x28] sm:$0xff] }
   0x3   :  { %v248_v3 = vld [vmem:[%s304_s4] sm:$0xff]  ;;  %v89_v20 = vld [vmem:[%s305_s2 + $0x18] sm:$0xff]  ;;  %v88_v22 = vld [vmem:[%s305_s2 + $0x10] sm:$0xff] }
   0x4   :  { %44 = vmatpush.msra.mxu0 %v22_v1  ;;  %v24_v4 = vperm.slane %v248_v3, 0  ;;  %107 = vmatpush.msra.mxu1 %v92_v16  ;;  %v90_v19 = vld [vmem:[%s305_s2 + $0x20] sm:$0xff]  ;;  %v87_v24 = vld [vmem:[%s305_s2 + $0x8] sm:$0xff]  ;;  %v81_v39 = vperm.slane %v248_v3, 1  ;;  %v83_v42 = vperm.slane %v248_v3, 2  ;;  %v94_v46 = vperm.slane %v248_v3, 3 }
   0x5   :  { %189 = vmatmul.msk.f32.vlgmr.msra.gmra.mxu0 %vm25_vm0, %v21_v2  ;;  %v86_v26 = vld [vmem:[%s305_s2] sm:$0xff]  ;;  %v158_v58 = vld [vmem:[%s306_s3 + $0x18] sm:$0xff]  ;;  %v157_v59 = vld [vmem:[%s306_s3 + $0x10] sm:$0xff]  ;;  %v150_v14 = vperm.slane %v248_v3, 4 }
   0x6   :  { %108 = vmatpush.msra.mxu1 %v91_v17  ;;  %175 = vmatpush.msra.mxu2 %v158_v58  ;;  %v156_v61 = vld [vmem:[%s306_s3 + $0x8] sm:$0xff]  ;;  %v155_v63 = vld [vmem:[%s306_s3] sm:$0xff]  ;;  %v152_v17 = vperm.slane %v248_v3, 5 }
   0x7   :  { %v195_v11 = vpop.eup %194 }
   0x8   :  { %v54_v12 = vmul.f32 64.0, %v195_v11  ;;  %vm58_vm2 = vweird.f32 %v195_v11  ;;  %109 = vmatpush.msra.mxu1 %v90_v19  ;;  %176 = vmatpush.msra.mxu2 %v157_v59 }
   0xa   :  { %v55_v13 = vsub.f32 1.0, %v54_v12  ;;  %110 = vmatpush.msra.mxu1 %v89_v20  ;;  %177 = vmatpush.msra.mxu2 %v156_v61 }
   0xc   :  { %v56_v15 = vmul.f32 %v195_v11, %v55_v13  ;;  %111 = vmatpush.msra.mxu1 %v88_v22  ;;  %178 = vmatpush.msra.mxu2 %v155_v63 }
   0xe   :  { %v57_v18 = vadd.f32 %v195_v11, %v56_v15  ;;  %112 = vmatpush.msra.mxu1 %v87_v24 }
  0x10   :  { %v59_v23 = vsel %vm58_vm2, %v195_v11, %v57_v18  ;;  %113 = vmatpush.msra.mxu1 %v86_v26 }
  0x82   :  { %v46_v5 = vpop.f32.mrf.mxu0 }
  0x83   :  { %v47_v6 = vadd.f32 %v46_v5, %v24_v4 }
  0x85   :  { %v50_v7 = vsel %vm49_vm1, %v47_v6, 0.0  ;;  %v61_v8 = vmul.f32 %v47_v6, %v47_v6 }
  0x86   :  { %51 = vadd.xlane.f32.xlu0 %v50_v7 }
  0x87   :  { %v62_v9 = vsel %vm49_vm1, %v61_v8, 0.0 }
  0x8e   :  { %63 = vadd.xlane.f32.xlu0 %v62_v9 }
  0xf9   :  { %v52_v21 = vpop.xlane.xlu0 %51 }
  0xfa   :  { %v60_v25 = vmul.f32 %v59_v23, %v52_v21  ;;  %v159_v21 = vperm.slane %v248_v3, 6 }
  0xfc   :  { %v66_v28 = vmul.f32 %v60_v25, %v60_v25  ;;  %v68_v38 = vsub.f32 %v47_v6, %v60_v25 }
 0x101   :  { %v64_v27 = vpop.xlane.xlu0 %63 }
 0x102   :  { %v65_v29 = vmul.f32 %v64_v27, %v59_v23 }
 0x104   :  { %v67_v30 = vsub.f32 %v65_v29, %v66_v28 }
 0x106   :  { %v69_v31 = vadd.f32 1e-05, %v67_v30 }
 0x108   :  { %196 = vrsqrt.f32 %v69_v31  ;;  %vm76_vm4 = vweird.f32 %v69_v31 }
 0x109   :  { %198 = vrcp.f32 %v205_v52 }
 0x10e   :  { %v197_v32 = vpop.eup %196 }
 0x10f   :  { %v71_v33 = vmul.f32 %v197_v32, %v69_v31  ;;  %vm77_vm3 = vweird.f32 %v197_v32  ;;  %v199_v53 = vpop.eup %198 }
 0x110   :  { %vm78_vm5 = vmor %vm76_vm4, %vm77_vm3  ;;  %v123_v54 = vmul.f32 32.0, %v199_v53  ;;  %vm127_vm7 = vweird.f32 %v199_v53 }
 0x111   :  { %v72_v34 = vmul.f32 %v197_v32, %v71_v33 }
 0x112   :  { %v124_v55 = vsub.f32 1.0, %v123_v54 }
 0x113   :  { %v73_v35 = vmul.f32 0.5, %v72_v34 }
 0x114   :  { %v125_v56 = vmul.f32 %v199_v53, %v124_v55 }
 0x115   :  { %v74_v36 = vsub.f32 1.5, %v73_v35 }
 0x116   :  { %v126_v57 = vadd.f32 %v199_v53, %v125_v56 }
 0x117   :  { %v75_v37 = vmul.f32 %v197_v32, %v74_v36 }
 0x118   :  { %v128_v62 = vsel %vm127_vm7, %v199_v53, %v126_v57 }
 0x119   :  { %v79_v40 = vsel %vm78_vm5, %v197_v32, %v75_v37 }
 0x11a   :  { %v80_v41 = vmul.f32 %v79_v40, %v68_v38 }
 0x11c   :  { %v82_v43 = vmul.f32 %v81_v39, %v80_v41 }
 0x11e   :  { %v84_v44 = vadd.f32 %v83_v42, %v82_v43 }
 0x120   :  { %v85_v45 = vmax.f32 %v84_v44, 0.0 }
 0x122   :  { %190 = vmatmul.msk.f32.vlgmr.msra.gmra.mxu1 %vm49_vm1, %v85_v45 }
 0x19f   :  { %v115_v47 = vpop.f32.mrf.mxu1 }
 0x1a0   :  { %v116_v48 = vadd.f32 %v115_v47, %v94_v46 }
 0x1a2   :  { %v119_v49 = vsel %vm118_vm6, %v116_v48, 0.0  ;;  %v130_v50 = vmul.f32 %v116_v48, %v116_v48 }
 0x1a3   :  { %120 = vadd.xlane.f32.xlu1 %v119_v49 }
 0x1a4   :  { %v131_v51 = vsel %vm118_vm6, %v130_v50, 0.0 }
 0x1ab   :  { %132 = vadd.xlane.f32.xlu1 %v131_v51 }
 0x216   :  { %v121_v60 = vpop.xlane.xlu1 %120 }
 0x217   :  { %v129_v0 = vmul.f32 %v128_v62, %v121_v60 }
 0x219   :  { %v135_v2 = vmul.f32 %v129_v0, %v129_v0  ;;  %v137_v13 = vsub.f32 %v116_v48, %v129_v0 }
 0x21e   :  { %v133_v1 = vpop.xlane.xlu1 %132 }
 0x21f   :  { %v134_v4 = vmul.f32 %v133_v1, %v128_v62 }
 0x221   :  { %v136_v5 = vsub.f32 %v134_v4, %v135_v2 }
 0x223   :  { %v138_v6 = vadd.f32 1e-05, %v136_v5 }
 0x225   :  { %200 = vrsqrt.f32 %v138_v6  ;;  %vm145_vm9 = vweird.f32 %v138_v6 }
 0x22b   :  { %v201_v7 = vpop.eup %200 }
 0x22c   :  { %v140_v8 = vmul.f32 %v201_v7, %v138_v6  ;;  %vm146_vm8 = vweird.f32 %v201_v7 }
 0x22d   :  { %vm147_vm10 = vmor %vm145_vm9, %vm146_vm8 }
 0x22e   :  { %v141_v9 = vmul.f32 %v201_v7, %v140_v8 }
 0x230   :  { %v142_v10 = vmul.f32 0.5, %v141_v9 }
 0x232   :  { %v143_v11 = vsub.f32 1.5, %v142_v10 }
 0x234   :  { %v144_v12 = vmul.f32 %v201_v7, %v143_v11 }
 0x236   :  { %v148_v15 = vsel %vm147_vm10, %v201_v7, %v144_v12 }
 0x237   :  { %v149_v16 = vmul.f32 %v148_v15, %v137_v13 }
 0x239   :  { %v151_v18 = vmul.f32 %v150_v14, %v149_v16 }
 0x23b   :  { %v153_v19 = vadd.f32 %v152_v17, %v151_v18 }
 0x23d   :  { %v154_v20 = vmax.f32 %v153_v19, 0.0 }
 0x23f   :  { %191 = vmatmul.msk.f32.vlgmr.msra.gmra.mxu2 %vm118_vm6, %v154_v20 }
 0x2c2   :  { %v180_v22 = vpop.f32.mrf.mxu2 }
 0x2c3   :  { %v181_v23 = vadd.f32 %v180_v22, %v159_v21 }
 0x2c5   :  { %202 = vtanh.f32 %v181_v23 }
 0x2cb   :  { %v203_v24 = vpop.eup %202 }
 0x2cc   :  { %184 = vst [vmem:[%s307_s5] sm:$0xff] %v203_v24 }

</bundles_post_ra>
